<compile_context>
chip_gen: v7x
topology: tpu7x:2x2x1
jax: 0.10.0
libtpu: 0.0.40
codegen_flags: <defaults>
</compile_context>

<pallas_src>
import functools

import jax
import jax.numpy as jnp
from jax.experimental import pallas as pl
from jax.experimental.pallas import tpu as pltpu


# --- small, deterministic hyperparameters consistent with STL's forward ---
TOKEN_NUM = 10                         # hp.token_num
TTS_EMBED_DIMS = 32                    # hp.tts_embed_dims (== num_units E)
NUM_HEADS = 4                          # hp.num_heads
D_Q = TTS_EMBED_DIMS // 2              # query dim  = E // 2
D_K = TTS_EMBED_DIMS // NUM_HEADS      # key dim    = E // num_heads
D_HEAD = TTS_EMBED_DIMS // NUM_HEADS   # per-head split size (num_units // H)


def _stl_attention_kernel(x_ref, wq_ref, kt_ref, v_ref, o_ref, *, num_heads):
    """Per-call attention only.

    x_ref  : [Np, d_q]          padded query batch
    wq_ref : [H, d_q, d_head]   per-head query projection, 1/sqrt(key_dim) folded in
    kt_ref : [H, d_head, T]     precomputed (tanh(embed) @ Wk) split per head, transposed
    v_ref  : [H, T, d_head]     precomputed (tanh(embed) @ Wv) split per head
    o_ref  : [Np, H*d_head]
    """
    x = x_ref[...]                                                   # [Np, d_q]
    head_outs = []
    for h in range(num_heads):                                       # static, unrolled (H=4)
        # Leading-axis (static) indexing of the 3-D refs -> no lane slices, no transposes.
        qh = jnp.dot(x, wq_ref[h], preferred_element_type=jnp.float32)     # [Np, d_head]
        s = jnp.dot(qh, kt_ref[h], preferred_element_type=jnp.float32)     # [Np, T] (scale pre-folded)
        m = jnp.max(s, axis=-1, keepdims=True)
        p = jnp.exp(s - m)
        denom = jnp.sum(p, axis=-1, keepdims=True)
        p = p * pl.reciprocal(denom, approx=True)                          # EUP, not VALU divide
        head_outs.append(jnp.dot(p, v_ref[h], preferred_element_type=jnp.float32))  # [Np, d_head]
    # Single full-width store (no per-head masked partial stores).
    o_ref[...] = jnp.concatenate(head_outs, axis=-1)                 # [Np, U]


def prepare_stl_params(embed, wq, wk, wv, *, num_heads):
    """One-time (weight-load-time) preparation of all input-independent tensors."""
    T, d_k = embed.shape
    d_q, U = wq.shape
    d_head = U // num_heads
    scale = 1.0 / (d_k ** 0.5)                    # PyTorch: scores / key_dim ** 0.5

    keys = jnp.tanh(embed)                        # [T, d_k]   (tanh hoisted out of per-call path)
    k = keys @ wk                                 # [T, U]
    v = keys @ wv                                 # [T, U]

    # Per-head, kernel-friendly layouts.
    wq_heads = (wq * scale).reshape(d_q, num_heads, d_head).transpose(1, 0, 2)  # [H, d_q, dh]
    kt_heads = k.reshape(T, num_heads, d_head).transpose(1, 2, 0)               # [H, dh, T] (K^T)
    v_heads = v.reshape(T, num_heads, d_head).transpose(1, 0, 2)                # [H, T, dh]
    return (jnp.asarray(wq_heads, jnp.float32),
            jnp.asarray(kt_heads, jnp.float32),
            jnp.asarray(v_heads, jnp.float32))


def stl_forward(inputs, wq_heads, kt_heads, v_heads, *, num_heads):
    """STL.forward(inputs, gst_index) -- `inputs is not None` branch.

    inputs: [N, E//2] -> style_embed [N, 1, E].  (gst_index is unused on this path.)
    """
    N, d_q = inputs.shape
    H, _, d_head = wq_heads.shape
    U = H * d_head

    # Pad batch to a multiple of 8 so the output rows fill whole sublanes.
    n_pad = max(8, ((N + 7) // 8) * 8)
    if n_pad != N:
        x = jnp.zeros((n_pad, d_q), inputs.dtype).at[:N].set(inputs)
    else:
        x = inputs

    kernel = functools.partial(_stl_attention_kernel, num_heads=num_heads)
    vmem = pltpu.MemorySpace.VMEM
    # No grid: shapes are tiny, so every operand is a whole-array VMEM block and
    # the kernel runs as a single invocation (no pipeline prologue/epilogue).
    out = pl.pallas_call(
        kernel,
        in_specs=[
            pl.BlockSpec(memory_space=vmem),   # x
            pl.BlockSpec(memory_space=vmem),   # wq_heads
            pl.BlockSpec(memory_space=vmem),   # kt_heads
            pl.BlockSpec(memory_space=vmem),   # v_heads
        ],
        out_specs=pl.BlockSpec(memory_space=vmem),
        out_shape=jax.ShapeDtypeStruct((n_pad, U), jnp.float32),
    )(x, wq_heads, kt_heads, v_heads)
    return out[:N].reshape(N, 1, U)


def stl_reference(inputs, embed, wq, wk, wv, *, num_heads):
    """Pure-JAX replica of the PyTorch forward (for correctness check)."""
    N = inputs.shape[0]
    d_k = embed.shape[1]
    keys = jnp.broadcast_to(jnp.tanh(embed)[None], (N,) + embed.shape)  # [N, T, d_k]
    query = inputs[:, None, :]                                          # [N, 1, d_q]
    qs = query @ wq                                                     # [N, 1, U]
    ks = keys @ wk                                                      # [N, T, U]
    vs = keys @ wv
    qs = jnp.stack(jnp.split(qs, num_heads, axis=2), axis=0)            # [H, N, 1, dh]
    ks = jnp.stack(jnp.split(ks, num_heads, axis=2), axis=0)
    vs = jnp.stack(jnp.split(vs, num_heads, axis=2), axis=0)
    scores = (qs @ jnp.swapaxes(ks, 2, 3)) / (d_k ** 0.5)               # [H, N, 1, T]
    scores = jax.nn.softmax(scores, axis=3)
    out = scores @ vs                                                   # [H, N, 1, dh]
    out = jnp.concatenate(jnp.split(out, num_heads, axis=0), axis=3)[0] # [N, 1, U]
    return out


if __name__ == "__main__":
    key = jax.random.PRNGKey(0)
    k1, k2, k3, k4, k5 = jax.random.split(key, 5)

    N = 2
    inputs = jax.random.normal(k1, (N, D_Q), dtype=jnp.float32)

    # self.embed ~ Normal(mean=0, std=0.5)  (init.normal_)
    embed = 0.5 * jax.random.normal(k2, (TOKEN_NUM, D_K), dtype=jnp.float32)
    # nn.Linear(bias=False) weights, stored here as [in, out]
    wq = jax.random.normal(k3, (D_Q, TTS_EMBED_DIMS), dtype=jnp.float32) / jnp.sqrt(D_Q)
    wk = jax.random.normal(k4, (D_K, TTS_EMBED_DIMS), dtype=jnp.float32) / jnp.sqrt(D_K)
    wv = jax.random.normal(k5, (D_K, TTS_EMBED_DIMS), dtype=jnp.float32) / jnp.sqrt(D_K)

    # One-time prep (weight-load time): hoists tanh/K/V/scale/transpose out of the call path.
    wq_heads, kt_heads, v_heads = prepare_stl_params(embed, wq, wk, wv, num_heads=NUM_HEADS)

    style_embed = stl_forward(inputs, wq_heads, kt_heads, v_heads, num_heads=NUM_HEADS)
    style_embed = jax.block_until_ready(style_embed)

    ref = stl_reference(inputs, embed, wq, wk, wv, num_heads=NUM_HEADS)
    assert style_embed.shape == (N, 1, TTS_EMBED_DIMS), style_embed.shape
    # Tolerance is loosened slightly vs exact f32 because the softmax denominator
    # uses the approximate EUP reciprocal (rel. err ~2^-12).
    assert jnp.allclose(style_embed, ref, atol=2e-3, rtol=2e-3), "mismatch vs reference"
    print("KERNEL_OK")
</pallas_src>

<mosaic_0001>
module attributes {stable_mosaic.version = 11 : i64} {
  func.func @_stl_attention_kernel(%arg0: memref<8x16xf32, #tpu.memory_space<vmem>>, %arg1: memref<4x16x8xf32, #tpu.memory_space<vmem>>, %arg2: memref<4x8x10xf32, #tpu.memory_space<vmem>>, %arg3: memref<4x10x8xf32, #tpu.memory_space<vmem>>, %arg4: memref<8x32xf32, #tpu.memory_space<vmem>>) attributes {dimension_semantics = [], scalar_prefetch = 0 : i64, scratch_operands = 0 : i64, tpu.core_type = #tpu.core_type<tc>} {
    %c0 = arith.constant 0 : index
    %c0_0 = arith.constant 0 : index
    %0 = vector.load %arg0[%c0, %c0_0] : memref<8x16xf32, #tpu.memory_space<vmem>>, vector<8x16xf32>
    %c0_1 = arith.constant 0 : index
    %c0_2 = arith.constant 0 : index
    %c0_3 = arith.constant 0 : index
    %1 = vector.load %arg1[%c0_1, %c0_2, %c0_3] : memref<4x16x8xf32, #tpu.memory_space<vmem>>, vector<1x16x8xf32>
    %2 = vector.shape_cast %1 : vector<1x16x8xf32> to vector<16x8xf32>
    %cst = arith.constant dense<0.000000e+00> : vector<8x8xf32>
    %3 = tpu.matmul %0, %2, %cst {dimension_numbers = #tpu.dot_dimension_numbers<[1], [0], [0], [1], [0, 0, 1, 1], [], []>} : vector<8x16xf32>, vector<16x8xf32>, vector<8x8xf32> -> vector<8x8xf32>
    %c0_4 = arith.constant 0 : index
    %c0_5 = arith.constant 0 : index
    %c0_6 = arith.constant 0 : index
    %4 = vector.load %arg2[%c0_4, %c0_5, %c0_6] : memref<4x8x10xf32, #tpu.memory_space<vmem>>, vector<1x8x10xf32>
    %5 = vector.shape_cast %4 : vector<1x8x10xf32> to vector<8x10xf32>
    %cst_7 = arith.constant dense<0.000000e+00> : vector<8x10xf32>
    %6 = tpu.matmul %3, %5, %cst_7 {dimension_numbers = #tpu.dot_dimension_numbers<[1], [0], [0], [1], [0, 0, 1, 1], [], []>} : vector<8x8xf32>, vector<8x10xf32>, vector<8x10xf32> -> vector<8x10xf32>
    %cst_8 = arith.constant dense<0xFF800000> : vector<8xf32>
    %7 = vector.multi_reduction <maximumf>, %6, %cst_8 [1] : vector<8x10xf32> to vector<8xf32>
    %8 = vector.shape_cast %7 : vector<8xf32> to vector<8x1xf32>
    %9 = vector.broadcast %8 : vector<8x1xf32> to vector<8x10xf32>
    %10 = arith.subf %6, %9 : vector<8x10xf32>
    %11 = math.exp %10 : vector<8x10xf32>
    %cst_9 = arith.constant dense<0.000000e+00> : vector<8xf32>
    %12 = vector.multi_reduction <add>, %11, %cst_9 [1] : vector<8x10xf32> to vector<8xf32>
    %13 = vector.shape_cast %12 : vector<8xf32> to vector<8x1xf32>
    %14 = tpu.reciprocal %13 {approx = true} : vector<8x1xf32> -> vector<8x1xf32>
    %15 = vector.broadcast %14 : vector<8x1xf32> to vector<8x10xf32>
    %16 = arith.mulf %11, %15 : vector<8x10xf32>
    %c0_10 = arith.constant 0 : index
    %c0_11 = arith.constant 0 : index
    %c0_12 = arith.constant 0 : index
    %17 = vector.load %arg3[%c0_10, %c0_11, %c0_12] : memref<4x10x8xf32, #tpu.memory_space<vmem>>, vector<1x10x8xf32>
    %18 = vector.shape_cast %17 : vector<1x10x8xf32> to vector<10x8xf32>
    %cst_13 = arith.constant dense<0.000000e+00> : vector<8x8xf32>
    %19 = tpu.matmul %16, %18, %cst_13 {dimension_numbers = #tpu.dot_dimension_numbers<[1], [0], [0], [1], [0, 0, 1, 1], [], []>} : vector<8x10xf32>, vector<10x8xf32>, vector<8x8xf32> -> vector<8x8xf32>
    %c1 = arith.constant 1 : index
    %c0_14 = arith.constant 0 : index
    %c0_15 = arith.constant 0 : index
    %20 = vector.load %arg1[%c1, %c0_14, %c0_15] : memref<4x16x8xf32, #tpu.memory_space<vmem>>, vector<1x16x8xf32>
    %21 = vector.shape_cast %20 : vector<1x16x8xf32> to vector<16x8xf32>
    %cst_16 = arith.constant dense<0.000000e+00> : vector<8x8xf32>
    %22 = tpu.matmul %0, %21, %cst_16 {dimension_numbers = #tpu.dot_dimension_numbers<[1], [0], [0], [1], [0, 0, 1, 1], [], []>} : vector<8x16xf32>, vector<16x8xf32>, vector<8x8xf32> -> vector<8x8xf32>
    %c1_17 = arith.constant 1 : index
    %c0_18 = arith.constant 0 : index
    %c0_19 = arith.constant 0 : index
    %23 = vector.load %arg2[%c1_17, %c0_18, %c0_19] : memref<4x8x10xf32, #tpu.memory_space<vmem>>, vector<1x8x10xf32>
    %24 = vector.shape_cast %23 : vector<1x8x10xf32> to vector<8x10xf32>
    %cst_20 = arith.constant dense<0.000000e+00> : vector<8x10xf32>
    %25 = tpu.matmul %22, %24, %cst_20 {dimension_numbers = #tpu.dot_dimension_numbers<[1], [0], [0], [1], [0, 0, 1, 1], [], []>} : vector<8x8xf32>, vector<8x10xf32>, vector<8x10xf32> -> vector<8x10xf32>
    %cst_21 = arith.constant dense<0xFF800000> : vector<8xf32>
    %26 = vector.multi_reduction <maximumf>, %25, %cst_21 [1] : vector<8x10xf32> to vector<8xf32>
    %27 = vector.shape_cast %26 : vector<8xf32> to vector<8x1xf32>
    %28 = vector.broadcast %27 : vector<8x1xf32> to vector<8x10xf32>
    %29 = arith.subf %25, %28 : vector<8x10xf32>
    %30 = math.exp %29 : vector<8x10xf32>
    %cst_22 = arith.constant dense<0.000000e+00> : vector<8xf32>
    %31 = vector.multi_reduction <add>, %30, %cst_22 [1] : vector<8x10xf32> to vector<8xf32>
    %32 = vector.shape_cast %31 : vector<8xf32> to vector<8x1xf32>
    %33 = tpu.reciprocal %32 {approx = true} : vector<8x1xf32> -> vector<8x1xf32>
    %34 = vector.broadcast %33 : vector<8x1xf32> to vector<8x10xf32>
    %35 = arith.mulf %30, %34 : vector<8x10xf32>
    %c1_23 = arith.constant 1 : index
    %c0_24 = arith.constant 0 : index
    %c0_25 = arith.constant 0 : index
    %36 = vector.load %arg3[%c1_23, %c0_24, %c0_25] : memref<4x10x8xf32, #tpu.memory_space<vmem>>, vector<1x10x8xf32>
    %37 = vector.shape_cast %36 : vector<1x10x8xf32> to vector<10x8xf32>
    %cst_26 = arith.constant dense<0.000000e+00> : vector<8x8xf32>
    %38 = tpu.matmul %35, %37, %cst_26 {dimension_numbers = #tpu.dot_dimension_numbers<[1], [0], [0], [1], [0, 0, 1, 1], [], []>} : vector<8x10xf32>, vector<10x8xf32>, vector<8x8xf32> -> vector<8x8xf32>
    %c2 = arith.constant 2 : index
    %c0_27 = arith.constant 0 : index
    %c0_28 = arith.constant 0 : index
    %39 = vector.load %arg1[%c2, %c0_27, %c0_28] : memref<4x16x8xf32, #tpu.memory_space<vmem>>, vector<1x16x8xf32>
    %40 = vector.shape_cast %39 : vector<1x16x8xf32> to vector<16x8xf32>
    %cst_29 = arith.constant dense<0.000000e+00> : vector<8x8xf32>
    %41 = tpu.matmul %0, %40, %cst_29 {dimension_numbers = #tpu.dot_dimension_numbers<[1], [0], [0], [1], [0, 0, 1, 1], [], []>} : vector<8x16xf32>, vector<16x8xf32>, vector<8x8xf32> -> vector<8x8xf32>
    %c2_30 = arith.constant 2 : index
    %c0_31 = arith.constant 0 : index
    %c0_32 = arith.constant 0 : index
    %42 = vector.load %arg2[%c2_30, %c0_31, %c0_32] : memref<4x8x10xf32, #tpu.memory_space<vmem>>, vector<1x8x10xf32>
    %43 = vector.shape_cast %42 : vector<1x8x10xf32> to vector<8x10xf32>
    %cst_33 = arith.constant dense<0.000000e+00> : vector<8x10xf32>
    %44 = tpu.matmul %41, %43, %cst_33 {dimension_numbers = #tpu.dot_dimension_numbers<[1], [0], [0], [1], [0, 0, 1, 1], [], []>} : vector<8x8xf32>, vector<8x10xf32>, vector<8x10xf32> -> vector<8x10xf32>
    %cst_34 = arith.constant dense<0xFF800000> : vector<8xf32>
    %45 = vector.multi_reduction <maximumf>, %44, %cst_34 [1] : vector<8x10xf32> to vector<8xf32>
    %46 = vector.shape_cast %45 : vector<8xf32> to vector<8x1xf32>
    %47 = vector.broadcast %46 : vector<8x1xf32> to vector<8x10xf32>
    %48 = arith.subf %44, %47 : vector<8x10xf32>
    %49 = math.exp %48 : vector<8x10xf32>
    %cst_35 = arith.constant dense<0.000000e+00> : vector<8xf32>
    %50 = vector.multi_reduction <add>, %49, %cst_35 [1] : vector<8x10xf32> to vector<8xf32>
    %51 = vector.shape_cast %50 : vector<8xf32> to vector<8x1xf32>
    %52 = tpu.reciprocal %51 {approx = true} : vector<8x1xf32> -> vector<8x1xf32>
    %53 = vector.broadcast %52 : vector<8x1xf32> to vector<8x10xf32>
    %54 = arith.mulf %49, %53 : vector<8x10xf32>
    %c2_36 = arith.constant 2 : index
    %c0_37 = arith.constant 0 : index
    %c0_38 = arith.constant 0 : index
    %55 = vector.load %arg3[%c2_36, %c0_37, %c0_38] : memref<4x10x8xf32, #tpu.memory_space<vmem>>, vector<1x10x8xf32>
    %56 = vector.shape_cast %55 : vector<1x10x8xf32> to vector<10x8xf32>
    %cst_39 = arith.constant dense<0.000000e+00> : vector<8x8xf32>
    %57 = tpu.matmul %54, %56, %cst_39 {dimension_numbers = #tpu.dot_dimension_numbers<[1], [0], [0], [1], [0, 0, 1, 1], [], []>} : vector<8x10xf32>, vector<10x8xf32>, vector<8x8xf32> -> vector<8x8xf32>
    %c3 = arith.constant 3 : index
    %c0_40 = arith.constant 0 : index
    %c0_41 = arith.constant 0 : index
    %58 = vector.load %arg1[%c3, %c0_40, %c0_41] : memref<4x16x8xf32, #tpu.memory_space<vmem>>, vector<1x16x8xf32>
    %59 = vector.shape_cast %58 : vector<1x16x8xf32> to vector<16x8xf32>
    %cst_42 = arith.constant dense<0.000000e+00> : vector<8x8xf32>
    %60 = tpu.matmul %0, %59, %cst_42 {dimension_numbers = #tpu.dot_dimension_numbers<[1], [0], [0], [1], [0, 0, 1, 1], [], []>} : vector<8x16xf32>, vector<16x8xf32>, vector<8x8xf32> -> vector<8x8xf32>
    %c3_43 = arith.constant 3 : index
    %c0_44 = arith.constant 0 : index
    %c0_45 = arith.constant 0 : index
    %61 = vector.load %arg2[%c3_43, %c0_44, %c0_45] : memref<4x8x10xf32, #tpu.memory_space<vmem>>, vector<1x8x10xf32>
    %62 = vector.shape_cast %61 : vector<1x8x10xf32> to vector<8x10xf32>
    %cst_46 = arith.constant dense<0.000000e+00> : vector<8x10xf32>
    %63 = tpu.matmul %60, %62, %cst_46 {dimension_numbers = #tpu.dot_dimension_numbers<[1], [0], [0], [1], [0, 0, 1, 1], [], []>} : vector<8x8xf32>, vector<8x10xf32>, vector<8x10xf32> -> vector<8x10xf32>
    %cst_47 = arith.constant dense<0xFF800000> : vector<8xf32>
    %64 = vector.multi_reduction <maximumf>, %63, %cst_47 [1] : vector<8x10xf32> to vector<8xf32>
    %65 = vector.shape_cast %64 : vector<8xf32> to vector<8x1xf32>
    %66 = vector.broadcast %65 : vector<8x1xf32> to vector<8x10xf32>
    %67 = arith.subf %63, %66 : vector<8x10xf32>
    %68 = math.exp %67 : vector<8x10xf32>
    %cst_48 = arith.constant dense<0.000000e+00> : vector<8xf32>
    %69 = vector.multi_reduction <add>, %68, %cst_48 [1] : vector<8x10xf32> to vector<8xf32>
    %70 = vector.shape_cast %69 : vector<8xf32> to vector<8x1xf32>
    %71 = tpu.reciprocal %70 {approx = true} : vector<8x1xf32> -> vector<8x1xf32>
    %72 = vector.broadcast %71 : vector<8x1xf32> to vector<8x10xf32>
    %73 = arith.mulf %68, %72 : vector<8x10xf32>
    %c3_49 = arith.constant 3 : index
    %c0_50 = arith.constant 0 : index
    %c0_51 = arith.constant 0 : index
    %74 = vector.load %arg3[%c3_49, %c0_50, %c0_51] : memref<4x10x8xf32, #tpu.memory_space<vmem>>, vector<1x10x8xf32>
    %75 = vector.shape_cast %74 : vector<1x10x8xf32> to vector<10x8xf32>
    %cst_52 = arith.constant dense<0.000000e+00> : vector<8x8xf32>
    %76 = tpu.matmul %73, %75, %cst_52 {dimension_numbers = #tpu.dot_dimension_numbers<[1], [0], [0], [1], [0, 0, 1, 1], [], []>} : vector<8x10xf32>, vector<10x8xf32>, vector<8x8xf32> -> vector<8x8xf32>
    %77 = tpu.concatenate %19, %38, %57, %76 in 1 : vector<8x8xf32>, vector<8x8xf32>, vector<8x8xf32>, vector<8x8xf32> -> vector<8x32xf32>
    %c0_53 = arith.constant 0 : index
    %c0_54 = arith.constant 0 : index
    %78 = vector.load %arg4[%c0_53, %c0_54] : memref<8x32xf32, #tpu.memory_space<vmem>>, vector<8x32xf32>
    tpu.vector_store %arg4[%c0_53, %c0_54], %77 {strides = array<i32>} : memref<8x32xf32, #tpu.memory_space<vmem>>, vector<8x32xf32>,
    return
  }
}

</mosaic_0001>

<bundles_post_ra>
// kernel: tpu_custom_call.1
= control target key start
LH: loop header
LB: loop body
LE: loop exit
PB: predicated region body
PF: predicated region fallthrough
CT: control target
= control target key end

     0   :  { %v1222_v2 = vmov 0.0|0.0   ;;  %vm1223_vm0 = vmmov 0   ;;  %v1224_v4 = vmov 0.0   ;;  %s1409_s0 = inlined_call_operand.vmem [shape: f32[8,16], index: 0, kind: input, shape index: {}]   ;;  %s1410_s1 = inlined_call_operand.vmem [shape: f32[4,16,8], index: 1, kind: input, shape index: {}]   ;;  %s1411_s2 = inlined_call_operand.vmem [shape: f32[4,8,10], index: 2, kind: input, shape index: {}]   ;;  %s1412_s3 = inlined_call_operand.vmem [shape: f32[4,10,8], index: 3, kind: input, shape index: {}]   ;;  %s1413_s4 = inlined_call_operand.hbm [shape: f32[8,32], index: 4, kind: output, shape index: {}]  }
   0x1   :  { %v19_v0 = vld [vmem:[%s1410_s1] sm:$0xff]  ;;  %v20_v1 = vld [vmem:[%s1410_s1 + $0x8] sm:$0xff]  ;;  %1146 = vmatprep.subr.bf16.mxu0 %v1222_v2  ;;  %1074 = vmatprep.mubr.msk.f32.mxu0 %vm1223_vm0, %v1224_v4 }
   0x2   :  { %v1147_v3 = vpack.c.bf16 %v20_v1, %v19_v0 }
   0x3   :  { %9 = vsyncpa [#allocation3], 0  ;;  %1077 = vmatprep.subr.mxu1 %v1224_v4  ;;  %1079 = vmatprep.mubr.msk.f32.mxu1 %vm1223_vm0, %v1224_v4  ;;  %v1270_v5 = vld [vmem:[%s1409_s0] sm:$0xff]  ;;  %vm21_vm1 = vcmask 130048   ;;  %vm96_vm2 = vcmask 64512   ;;  %v1011_v9 = vld [vmem:[%s1410_s1 + $0x10] sm:$0xff] }
   0x4   :  { %1148 = vmatpush3.bf16.msra.mxu0 %v1147_v3  ;;  %v95_v6 = vld [vmem:[%s1411_s2] sm:$0xff]  ;;  %v1012_v10 = vld [vmem:[%s1410_s1 + $0x18] sm:$0xff]  ;;  %vm170_vm3 = vcmask 80896   ;;  %v183_v21 = vld [vmem:[%s1412_s3 + $0x8] sm:$0x3]  ;;  %vm187_vm4 = vcmask 1041408  }
   0x5   :  { %1153 = vmatprep.subr.bf16.mxu0 %v1222_v2  ;;  %1078 = vmatpush3.msra.mxu1 %v95_v6  ;;  %v1154_v11 = vpack.c.bf16 %v1012_v10, %v1011_v9  ;;  %v182_v20 = vld [vmem:[%s1412_s3] sm:$0xff]  ;;  %vm1225_vm5 = vmmov 1   ;;  %v1014_v29 = vld [vmem:[%s1411_s2 + $0x8] sm:$0xff]  ;;  %v1016_v43 = vld [vmem:[%s1412_s3 + $0x10] sm:$0xff]  ;;  %s1226_s24 = smov 8   ;;  %s1228_s29 = smov 24  }
   0x6   :  { %1149 = vmatprep.subr.bf16.mxu1 %v1222_v2  ;;  %v1150_v22 = vpack.c.bf16 %v183_v21, %v182_v20  ;;  %vm1303_vm6 = vmpackc.low %vm187_vm4, %vm1225_vm5  ;;  %v1020_v30 = vld [vmem:[%s1410_s1 + $0x20] sm:$0xff]  ;;  %v1021_v31 = vld [vmem:[%s1410_s1 + $0x28] sm:$0xff]  ;;  %s1229_s30 = smov [#allocation2]   ;;  %vm989_vm7 = vcmask 195584   ;;  %vm991_vm8 = vcmask 261120  }
   0x7   :  { %1075 = vmatmul.mubr.msk.f32.vlgmr.msra.gmra.mrb[0].mxu0 %vm21_vm1, %v1270_v5  ;;  %v1161_v32 = vpack.c.bf16 %v1021_v31, %v1020_v30  ;;  %v1017_v44 = vld [vmem:[%s1412_s3 + $0x18] sm:$0x3]  ;;  %v1023_v51 = vld [vmem:[%s1411_s2 + $0x10] sm:$0xff]  ;;  %v1025_v1 = vld [vmem:[%s1412_s3 + $0x20] sm:$0xff]  ;;  %s999_s5 = sshll.u32 %s1229_s30, 4  ;;  %s1000_s5 = int_to_ptr.vmem [resolvable:$true] %s999_s5 }
   0x8   :  { %1093 = vmatprep.mubr.msk.f32.mxu0 %vm1223_vm0, %v1224_v4  ;;  %1155 = vmatpush3.bf16.msra.mxu0 %v1154_v11  ;;  %v1157_v45 = vpack.c.bf16 %v1017_v44, %v1016_v43  ;;  %v1029_v52 = vld [vmem:[%s1410_s1 + $0x30] sm:$0xff]  ;;  %v1030_v53 = vld [vmem:[%s1410_s1 + $0x38] sm:$0xff]  ;;  %p1203_p1 = scmp.lt.s32.totalorder %s1000_s5, %s1000_s5 }
   0x9   :  { %1156 = vmatprep.subr.bf16.mxu0 %v1222_v2  ;;  %v1168_v54 = vpack.c.bf16 %v1030_v53, %v1029_v52  ;;  %v1032_v10 = vld [vmem:[%s1411_s2 + $0x18] sm:$0xff]  ;;  %s1227_s2 = smov 16  }
   0xa   :  { %v1035_v21 = vld [vmem:[%s1412_s3 + $0x38] sm:$0x3] }
   0xb   :  { %1094 = vmatmul.mubr.msk.f32.vlgmr.msra.gmra.mrb[2].mxu0 %vm21_vm1, %v1270_v5 }
   0xc   :  { %1105 = vmatprep.mubr.msk.f32.mxu0 %vm1223_vm0, %v1224_v4  ;;  %1159 = vmatpush3.bf16.msk.msra.mxu0 %vm1303_vm6, %v1157_v45 }
   0xd   :  { %1115 = vmatprep.subr.mxu0 %v1224_v4 }
  0xda   :  { %v91_v7 = vpop.f32.mrb[0].mxu0 }
  0xdb   :  { %v1076_v8 = vpop.f32.mrb[1].mxu0  ;;  %1080 = vmatmul.mubr.msk.f32.vlgmr.msra.gmra.mrb[0].mxu1 %vm96_vm2, %v91_v7 }
  0xdc   :  { %1086 = vmatprep.mubr.msk.f32.mxu1 %vm1223_vm0, %v1224_v4  ;;  %1152 = vmatpush3.bf16.msk.msra.mxu1 %vm1303_vm6, %v1150_v22 }
  0xdd   :  { %1096 = vmatprep.subr.mxu1 %v1224_v4 }
  0xde   :  { %v330_v24 = vpop.f32.mrb[2].mxu0 }
  0xdf   :  { %v1095_v25 = vpop.f32.mrb[3].mxu0 }
 0x1ae   :  { %v166_v12 = vpop.f32.mrb[0].mxu1 }
 0x1af   :  { %v1081_v13 = vpop.f32.mrb[1].mxu1  ;;  %v171_v14 = vsel %vm170_vm3, %v166_v12, -inf }
 0x1b0   :  { %172 = vmax.xlane.f32.xlu0 %v171_v14 }
 0x23d   :  { %v173_v15 = vpop.xlane.xlu0 %172 }
 0x23e   :  { %v174_v16 = vsub.f32 %v166_v12, %v173_v15 }
 0x240   :  { %v175_v17 = vmul.f32 1.442695, %v174_v16 }
 0x242   :  { %1182 = vpow2.f32 %v175_v17 }
 0x24c   :  { %v1183_v18 = vpop.eup %1182 }
 0x24d   :  { %v177_v19 = vsel %vm170_vm3, %v1183_v18, 0.0 }
 0x24e   :  { %178 = vadd.xlane.f32.xlu0 %v177_v19 }
 0x2db   :  { %v179_v26 = vpop.xlane.xlu0 %178 }
 0x2dc   :  { %1184 = vrcp.f32 %v179_v26 }
 0x2e6   :  { %v1185_v27 = vpop.eup %1184 }
 0x2e7   :  { %v181_v28 = vmul.f32 %v1185_v27, %v1183_v18 }
 0x2e9   :  { %1087 = vmatmul.mubr.msk.f32.vlgmr.msra.gmra.mrb[2].mxu1 %vm170_vm3, %v181_v28 }
 0x2ea   :  { %1097 = vmatpush3.msra.mxu1 %v1014_v29  ;;  %1098 = vmatprep.mubr.msk.f32.mxu1 %vm1223_vm0, %v1224_v4 }
 0x2eb   :  { %1160 = vmatprep.subr.bf16.mxu1 %v1222_v2 }
 0x2ed   :  { %1099 = vmatmul.mubr.msk.f32.vlgmr.msra.gmra.mrb[4].mxu1 %vm96_vm2, %v330_v24 }
 0x2ee   :  { %1112 = vmatprep.mubr.msk.f32.mxu1 %vm1223_vm0, %v1224_v4  ;;  %1162 = vmatpush3.bf16.msra.mxu1 %v1161_v32 }
 0x2ef   :  { %1163 = vmatprep.subr.bf16.mxu1 %v1222_v2 }
 0x2f1   :  { %1113 = vmatmul.mubr.msk.f32.vlgmr.msra.gmra.mrb[6].mxu1 %vm21_vm1, %v1270_v5 }
 0x2f2   :  { %1124 = vmatprep.mubr.msk.f32.mxu1 %vm1223_vm0, %v1224_v4 }
 0x3bc   :  { %v1331_v33 = vpop.f32.mrb[2].mxu1 }
 0x3bd   :  { %v1088_v34 = vpop.f32.mrb[3].mxu1 }
 0x3c0   :  { %v405_v35 = vpop.f32.mrb[4].mxu1 }
 0x3c1   :  { %v1100_v36 = vpop.f32.mrb[5].mxu1  ;;  %v409_v37 = vsel %vm170_vm3, %v405_v35, -inf }
 0x3c2   :  { %410 = vmax.xlane.f32.xlu1 %v409_v37 }
 0x3c4   :  { %v568_v46 = vpop.f32.mrb[6].mxu1 }
 0x3c5   :  { %v1114_v47 = vpop.f32.mrb[7].mxu1 }
 0x44f   :  { %v411_v38 = vpop.xlane.xlu1 %410 }
 0x450   :  { %v412_v39 = vsub.f32 %v405_v35, %v411_v38 }
 0x452   :  { %v413_v40 = vmul.f32 1.442695, %v412_v39 }
 0x454   :  { %1186 = vpow2.f32 %v413_v40 }
 0x45e   :  { %v1187_v41 = vpop.eup %1186 }
 0x45f   :  { %v415_v42 = vsel %vm170_vm3, %v1187_v41, 0.0 }
 0x460   :  { %416 = vadd.xlane.f32.xlu1 %v415_v42 }
 0x4ed   :  { %v417_v48 = vpop.xlane.xlu1 %416 }
 0x4ee   :  { %1188 = vrcp.f32 %v417_v48 }
 0x4f8   :  { %v1189_v49 = vpop.eup %1188 }
 0x4f9   :  { %v419_v50 = vmul.f32 %v1189_v49, %v1187_v41 }
 0x4fb   :  { %1106 = vmatmul.mubr.msk.f32.vlgmr.msra.gmra.mrb[4].mxu0 %vm170_vm3, %v419_v50 }
 0x4fc   :  { %1116 = vmatpush3.msra.mxu0 %v1023_v51  ;;  %1117 = vmatprep.mubr.msk.f32.mxu0 %vm1223_vm0, %v1224_v4 }
 0x4fd   :  { %1167 = vmatprep.subr.bf16.mxu0 %v1222_v2 }
 0x4ff   :  { %1118 = vmatmul.mubr.msk.f32.vlgmr.msra.gmra.mrb[6].mxu0 %vm96_vm2, %v568_v46 }
 0x500   :  { %1131 = vmatprep.mubr.msk.f32.mxu0 %vm1223_vm0, %v1224_v4  ;;  %1169 = vmatpush3.bf16.msra.mxu0 %v1168_v54 }
 0x501   :  { %1170 = vmatprep.subr.bf16.mxu0 %v1222_v2  ;;  %v1026_v2 = vld [vmem:[%s1412_s3 + $0x28] sm:$0x3] }
 0x502   :  { %v1164_v3 = vpack.c.bf16 %v1026_v2, %v1025_v1 }
 0x503   :  { %1132 = vmatmul.mubr.msk.f32.vlgmr.msra.gmra.mrb[8].mxu0 %vm21_vm1, %v1270_v5 }
 0x504   :  { %1143 = vmatprep.mubr.msk.f32.mxu0 %vm1223_vm0, %v1224_v4  ;;  %1166 = vmatpush3.bf16.msk.msra.mxu1 %vm1303_vm6, %v1164_v3 }
 0x505   :  { %1134 = vmatprep.subr.mxu1 %v1224_v4 }
 0x5ce   :  { %v495_v55 = vpop.f32.mrb[4].mxu0 }
 0x5cf   :  { %v1107_v56 = vpop.f32.mrb[5].mxu0 }
 0x5d2   :  { %v643_v57 = vpop.f32.mrb[6].mxu0 }
 0x5d3   :  { %v1119_v58 = vpop.f32.mrb[7].mxu0  ;;  %v647_v59 = vsel %vm170_vm3, %v643_v57, -inf }
 0x5d4   :  { %648 = vmax.xlane.f32.xlu0 %v647_v59 }
 0x5d6   :  { %v806_v5 = vpop.f32.mrb[8].mxu0 }
 0x5d7   :  { %v1133_v6 = vpop.f32.mrb[9].mxu0 }
 0x661   :  { %v649_v60 = vpop.xlane.xlu0 %648 }
 0x662   :  { %v650_v61 = vsub.f32 %v643_v57, %v649_v60 }
 0x664   :  { %v651_v62 = vmul.f32 1.442695, %v650_v61 }
 0x666   :  { %1190 = vpow2.f32 %v651_v62 }
 0x670   :  { %v1191_v63 = vpop.eup %1190 }
 0x671   :  { %v653_v0 = vsel %vm170_vm3, %v1191_v63, 0.0 }
 0x672   :  { %654 = vadd.xlane.f32.xlu1 %v653_v0 }
 0x6ff   :  { %v655_v7 = vpop.xlane.xlu1 %654 }
 0x700   :  { %1192 = vrcp.f32 %v655_v7 }
 0x70a   :  { %v1193_v8 = vpop.eup %1192 }
 0x70b   :  { %v657_v9 = vmul.f32 %v1193_v8, %v1191_v63 }
 0x70d   :  { %1125 = vmatmul.mubr.msk.f32.vlgmr.msra.gmra.mrb[8].mxu1 %vm170_vm3, %v657_v9 }
 0x70e   :  { %1135 = vmatpush3.msra.mxu1 %v1032_v10  ;;  %1136 = vmatprep.mubr.msk.f32.mxu1 %vm1223_vm0, %v1224_v4  ;;  %v1034_v4 = vld [vmem:[%s1412_s3 + $0x30] sm:$0xff]  ;;  %s1198_s3 = scalar_lea.vmem %s1000_s5, 128 }
 0x70f   :  { %v1171_v22 = vpack.c.bf16 %v1035_v21, %v1034_v4  ;;  %p1199_p0 = scmp.ne.s32.totalorder %s1000_s5, %s1198_s3  ;;  %p1204_p2 = scmp.lt.s32.totalorder %s1198_s3, %s1198_s3 }
 0x711   :  { %1137 = vmatmul.mubr.msk.f32.vlgmr.msra.gmra.mrb[10].mxu1 %vm96_vm2, %v806_v5  ;;  %1173 = vmatpush3.bf16.msk.msra.mxu0 %vm1303_vm6, %v1171_v22  ;;  %p1205_p3 = por %p1204_p2, %p1203_p1 }
 0x713   :  { %p1206_p4 = pnand %p1205_p3, %p1199_p0 }
 0x7e0   :  { %v733_v11 = vpop.f32.mrb[8].mxu1 }
 0x7e1   :  { %v1126_v12 = vpop.f32.mrb[9].mxu1 }
 0x7e4   :  { %v881_v13 = vpop.f32.mrb[10].mxu1 }
 0x7e5   :  { %v1138_v14 = vpop.f32.mrb[11].mxu1  ;;  %v885_v15 = vsel %vm170_vm3, %v881_v13, -inf }
 0x7e6   :  { %886 = vmax.xlane.f32.xlu0 %v885_v15 }
 0x7fc   :  { %976 = vrot.lane.b32.xlu0 %v495_v55, %s1226_s24 }
 0x873   :  { %v887_v16 = vpop.xlane.xlu0 %886 }
 0x874   :  { %v888_v17 = vsub.f32 %v881_v13, %v887_v16 }
 0x876   :  { %v889_v18 = vmul.f32 1.442695, %v888_v17 }
 0x877   :  { %v977_v29 = vpop.permute.xlu0 %976 }
 0x878   :  { %1194 = vpow2.f32 %v889_v18  ;;  %v987_v31 = vsel %vm96_vm2, %v1331_v33, %v977_v29 }
 0x882   :  { %v1195_v19 = vpop.eup %1194 }
 0x883   :  { %v891_v20 = vsel %vm170_vm3, %v1195_v19, 0.0 }
 0x884   :  { %892 = vadd.xlane.f32.xlu1 %v891_v20 }
 0x895   :  { %980 = vrot.lane.b32.xlu1 %v733_v11, %s1227_s2 }
 0x911   :  { %v893_v24 = vpop.xlane.xlu1 %892 }
 0x912   :  { %1196 = vrcp.f32 %v893_v24 }
 0x915   :  { %v981_v30 = vpop.permute.xlu1 %980 }
 0x916   :  { %v988_v23 = vsel %vm21_vm1, %v987_v31, %v981_v30 }
 0x91c   :  { %v1197_v25 = vpop.eup %1196 }
 0x91d   :  { %v895_v26 = vmul.f32 %v1197_v25, %v1195_v19 }
 0x91f   :  { %1144 = vmatmul.mubr.msk.f32.vlgmr.msra.gmra.mrb[10].mxu0 %vm170_vm3, %v895_v26 }
 0x9f2   :  { %v971_v27 = vpop.f32.mrb[10].mxu0 }
 0x9f3   :  { %984 = vrot.lane.b32.xlu1 %v971_v27, %s1228_s29  ;;  %v1145_v28 = vpop.f32.mrb[11].mxu0 }
 0xa65   :  { %v985_v32 = vpop.permute.xlu1 %984 }
 0xa66   :  { %v990_v34 = vsel %vm989_vm7, %v988_v23, %v985_v32 }
 0xa67   :  { %992 = vst.msk [vmem:[#allocation2] sm:$0xff] %vm991_vm8, %v990_v34 }
 0xa68   :  { %1209 = shalt.err (!%p1206_p4)
}
 0xa69   :  { %s1210_s8 = scalar_lea.hbm %s1413_s4, 128 }
 0xa6a   :  { %p1211_p5 = scmp.ne.s32.totalorder %s1413_s4, %s1210_s8  ;;  %p1214_p6 = scmp.lt.u32.totalorder %s1210_s8, %s1413_s4 }
 0xa6c   :  { %p1216_p7 = pnand %p1214_p6, %p1211_p5 }
 0xa6e   :  { %1219 = shalt.err (!%p1216_p7)
}
 0xa6f   :  { %1002 = dma.vmem_to_hbm [thread:$0]  %s1000_s5, 128, %s1413_s4, [#allocation3]  }
 0xa70   :  { %1220 = dma.done.wait [#allocation3], 128  }
 0xa71   :  { %1221 = vsyncadd [#allocation3], 4294967168 }
 0xa72   :  { %1006 = vsyncpa [#allocation3], 1 }

</bundles_post_ra>
